<compile_context>
chip_gen: v7x
topology: tpu7x:2x2x1
jax: 0.10.0
libtpu: 0.0.40
codegen_flags: <defaults>
</compile_context>

<pallas_src>
import numpy as np
import jax
import jax.numpy as jnp
from jax.experimental import pallas as pl
from jax.experimental.pallas import tpu as pltpu

_EPS = 1e-12


def _make_kernel(n, seq_len, n_cls, bt, lp, p):
    """Kernel closure over the static problem geometry."""
    need_ext = p > lp   # class-2 trace must be zero-extended from lp to p

    def kernel(x_ref, t_ref, s_ref, out_ref, *scratch):
        # x_ref/t_ref: (bt, C, lp) f32 blocks, zero padded beyond L (lanes)
        # and beyond N (batch rows).  s_ref (SMEM f32, length 2+C):
        #   [lambda1/(N*L*C), lambda2, w_0, ..., w_{C-1}]
        x = x_ref[...]
        t = t_ref[...]

        # ---- masks & per-class weights, built in-kernel (no extra HBM
        #      stream); cheap VPU filler under the EUP-bound BCE -------------
        lane = jax.lax.broadcasted_iota(jnp.int32, (bt, n_cls, lp), 2)
        brow = jax.lax.broadcasted_iota(jnp.int32, (bt, n_cls, lp), 0)
        cidx = jax.lax.broadcasted_iota(jnp.int32, (bt, n_cls, lp), 1)
        valid = (lane < seq_len) & ((pl.program_id(0) * bt + brow) < n)
        w = jnp.zeros((bt, n_cls, lp), jnp.float32)
        for c in range(n_cls):
            w = jnp.where(cidx == c, s_ref[2 + c], w)
        mult = jnp.where(valid, w, 0.0)

        # ---- weighted BCE-with-logits (numerically stable), block sum ------
        elem = jnp.maximum(x, 0.0) - x * t + jnp.log1p(jnp.exp(-jnp.abs(x)))
        bce_sum = jnp.sum(mult * elem)

        # ---- proximity penalty for the bt batch rows of this block ---------
        # For each batch: sum over all lags of the squared full
        # cross-correlation of the class-1 / class-2 logit traces.
        # A circulant of the zero-padded class-2 trace (period P >= 2L-1) is
        # built with ONE strided roll; the sum of squared circular lags then
        # equals the sum of squared linear F.conv1d(padding=L-1) lags exactly
        # (each circular lag aliases at most one non-zero linear lag, and the
        # loss only ever uses the sum of squares over ALL lags - do not reuse
        # `cc` per-lag).
        if need_ext:
            vbuf = scratch[0]                         # (1, p) f32 VMEM
            vbuf[:, lp:] = jnp.zeros((1, p - lp), jnp.float32)

        penalty = jnp.float32(0.0)
        for b in range(bt):                           # bt <= 8, fully unrolled
            xb = x_ref[b]                             # (C, lp)
            u = xb[1:2, :]                            # (1, lp) class-1 trace
            v = xb[2:3, :]                            # (1, lp) class-2 trace
            if need_ext:
                vbuf[:, :lp] = v
                v_full = vbuf[...]                    # (1, p), zero beyond L
            else:
                v_full = v                            # p == lp
            # Circulant: row r == v_full rotated by r lanes (one XLU op).
            circ = pltpu.roll(jnp.broadcast_to(v_full, (lp, p)),
                              shift=0, axis=1, stride=1, stride_axis=0)
            # All correlation lags in one bf16 MXU pass (f32 accumulation).
            cc = jnp.dot(u.astype(jnp.bfloat16), circ.astype(jnp.bfloat16),
                         preferred_element_type=jnp.float32)      # (1, p)
            cc_sq_sum = jnp.sum(cc * cc)
            energy = jnp.sum(u * u) * jnp.sum(v * v)
            # Padded batch rows have zero traces -> cc_sq_sum == 0 -> no-op.
            penalty = penalty + cc_sq_sum * jax.lax.rsqrt(energy + _EPS)

        total = s_ref[0] * bce_sum + s_ref[1] * penalty
        # Lane-dense partial: value in lane 0, zeros elsewhere (unmasked store,
        # wrapper reduces with a plain jnp.sum).
        out_ref[...] = jnp.where(
            jax.lax.broadcasted_iota(jnp.int32, out_ref.shape, 2) == 0,
            total, 0.0).astype(out_ref.dtype)

    return kernel


def bce_sleep_loss(predictions, targets, class_weights, lambda1, lambda2):
    """predictions, targets: (N, L, C) logits/targets.  Returns scalar loss."""
    n, seq_len, n_cls = predictions.shape
    assert n_cls >= 3, "proximity penalty uses class channels 1 and 2"

    lp = ((seq_len + 127) // 128) * 128                  # lane-padded length
    p = max(2 * seq_len - 1, 128)
    p = ((p + 127) // 128) * 128                         # correlation period

    # Batch tile: fill sublanes / amortize per-step overhead; keep grid >= 2
    # so v7x's two TensorCores both get work.
    bt = 1 if n < 2 else max(1, min(8, n // 2))

    def est_bytes(bt_):
        # double-buffered x/t blocks + worst-case live circulants + v scratch
        return 4 * (2 * 2 * bt_ * n_cls * lp + bt_ * lp * p + 2 * p + 256)

    while bt > 1 and est_bytes(bt) > 24 * 1024 * 1024:
        bt -= 1
    grid = (n + bt - 1) // bt
    n_pad = grid * bt

    # Layout plumbing: sequence axis onto lanes; pad only to lp (not to P) and
    # pad the batch up to a multiple of bt.  Padded rows/lanes are zeros and
    # are masked out of the BCE in-kernel.
    x = jnp.transpose(predictions.astype(jnp.float32), (0, 2, 1))   # (N, C, L)
    t = jnp.transpose(targets.astype(jnp.float32), (0, 2, 1))
    x = jnp.pad(x, ((0, n_pad - n), (0, 0), (0, lp - seq_len)))
    t = jnp.pad(t, ((0, n_pad - n), (0, 0), (0, lp - seq_len)))

    scalars = jnp.concatenate([
        jnp.array([lambda1 / float(n * seq_len * n_cls), lambda2], jnp.float32),
        jnp.asarray(class_weights, jnp.float32).reshape(-1),
    ])                                                                # SMEM

    need_ext = p > lp
    scratch_shapes = [pltpu.VMEM((1, p), jnp.float32)] if need_ext else []

    cparams = dict(dimension_semantics=("parallel",))
    est = est_bytes(bt)
    if est > 16 * 1024 * 1024:
        cparams["vmem_limit_bytes"] = int(min(est * 2, 64 * 1024 * 1024))

    kernel = _make_kernel(n, seq_len, n_cls, bt, lp, p)

    partials = pl.pallas_call(
        kernel,
        grid=(grid,),
        out_shape=jax.ShapeDtypeStruct((grid, 1, 128), jnp.float32),
        in_specs=[
            pl.BlockSpec((bt, n_cls, lp), lambda g: (g, 0, 0)),
            pl.BlockSpec((bt, n_cls, lp), lambda g: (g, 0, 0)),
            pl.BlockSpec(memory_space=pltpu.MemorySpace.SMEM),
        ],
        out_specs=pl.BlockSpec((1, 1, 128), lambda g: (g, 0, 0)),
        scratch_shapes=scratch_shapes,
        compiler_params=pltpu.CompilerParams(**cparams),
    )(x, t, scalars)

    # partial_g = lambda1*bce_partial_g + lambda2*penalty_g (lane 0 only).
    return jnp.sum(partials)


def _reference_loss(pred, tgt, class_weights, lambda1, lambda2):
    """Pure numpy reference mirroring the PyTorch module semantics."""
    x = np.asarray(pred, np.float64)
    t = np.asarray(tgt, np.float64)
    w = np.asarray(class_weights, np.float64).reshape(1, 1, -1)
    elem = np.maximum(x, 0.0) - x * t + np.log1p(np.exp(-np.abs(x)))
    bce = np.mean(w * elem)

    n, seq_len, _ = x.shape
    pen = 0.0
    for b in range(n):
        s1 = x[b, :, 1]
        s2 = x[b, :, 2]
        cc_sq = 0.0
        for d in range(-(seq_len - 1), seq_len):
            s = 0.0
            for m in range(seq_len):
                if 0 <= m + d < seq_len:
                    s += s1[m + d] * s2[m]
            cc_sq += s * s
        pen += cc_sq / np.sqrt((s1 ** 2).sum() * (s2 ** 2).sum())
    return lambda1 * bce + lambda2 * pen


if __name__ == "__main__":
    N, L, C = 2, 16, 3
    key = jax.random.PRNGKey(0)
    k1, k2 = jax.random.split(key)
    predictions = jax.random.normal(k1, (N, L, C), dtype=jnp.float32)
    targets = jax.random.uniform(k2, (N, L, C), dtype=jnp.float32)

    # Deterministic synthetic "module parameters".
    class_weights = jnp.array([1.0, 2.0, 2.0], dtype=jnp.float32)
    lambda1, lambda2 = 0.5, 0.1

    loss = bce_sleep_loss(predictions, targets, class_weights, lambda1, lambda2)
    loss = jax.block_until_ready(loss)

    ref = _reference_loss(np.asarray(predictions), np.asarray(targets),
                          np.asarray(class_weights), lambda1, lambda2)
    # Tolerance budgets the single-pass bf16 MXU correlation matmul; genuine
    # bugs produce O(1) deviations.
    np.testing.assert_allclose(float(loss), float(ref), rtol=2e-2, atol=2e-2)

    print("KERNEL_OK")
</pallas_src>

<mosaic_0001>
module attributes {stable_mosaic.version = 11 : i64} {
  func.func @kernel(%arg0: i32, %arg1: memref<1x3x128xf32, #tpu.memory_space<vmem>>, %arg2: memref<1x3x128xf32, #tpu.memory_space<vmem>>, %arg3: memref<5xf32, #tpu.memory_space<smem>>, %arg4: memref<1x1x128xf32, #tpu.memory_space<vmem>>) attributes {dimension_semantics = [#tpu.dimension_semantics<parallel>], iteration_bounds = array<i64: 2>, scalar_prefetch = 0 : i64, scratch_operands = 0 : i64, tpu.core_type = #tpu.core_type<tc>, window_params = [{transform_indices = @transform_0, window_bounds = array<i64: 1, 3, 128>}, {transform_indices = @transform_1, window_bounds = array<i64: 1, 3, 128>}, {transform_indices = @transform_2, window_bounds = array<i64: 5>}, {transform_indices = @transform_3, window_bounds = array<i64: 1, 1, 128>}]} {
    %c0 = arith.constant 0 : index
    %c0_0 = arith.constant 0 : index
    %c0_1 = arith.constant 0 : index
    %0 = vector.load %arg1[%c0, %c0_0, %c0_1] : memref<1x3x128xf32, #tpu.memory_space<vmem>>, vector<1x3x128xf32>
    %c0_2 = arith.constant 0 : index
    %c0_3 = arith.constant 0 : index
    %c0_4 = arith.constant 0 : index
    %1 = vector.load %arg2[%c0_2, %c0_3, %c0_4] : memref<1x3x128xf32, #tpu.memory_space<vmem>>, vector<1x3x128xf32>
    %2 = tpu.iota {dimensions = array<i32: 2>} : vector<1x3x128xi32>
    %3 = tpu.iota {dimensions = array<i32: 0>} : vector<1x3x128xi32>
    %4 = tpu.iota {dimensions = array<i32: 1>} : vector<1x3x128xi32>
    %c16_i32 = arith.constant 16 : i32
    %5 = vector.broadcast %c16_i32 : i32 to vector<1x3x128xi32>
    %6 = arith.cmpi slt, %2, %5 : vector<1x3x128xi32>
    %c1_i32 = arith.constant 1 : i32
    %7 = arith.muli %arg0, %c1_i32 : i32
    %8 = vector.broadcast %7 : i32 to vector<1x3x128xi32>
    %9 = arith.addi %8, %3 : vector<1x3x128xi32>
    %c2_i32 = arith.constant 2 : i32
    %10 = vector.broadcast %c2_i32 : i32 to vector<1x3x128xi32>
    %11 = arith.cmpi slt, %9, %10 : vector<1x3x128xi32>
    %12 = arith.andi %6, %11 : vector<1x3x128xi1>
    %cst = arith.constant 0.000000e+00 : f32
    %13 = vector.broadcast %cst : f32 to vector<1x3x128xf32>
    %c0_i32 = arith.constant 0 : i32
    %14 = vector.broadcast %c0_i32 : i32 to vector<1x3x128xi32>
    %15 = arith.cmpi eq, %4, %14 : vector<1x3x128xi32>
    %c2 = arith.constant 2 : index
    %16 = memref.load %arg3[%c2] : memref<5xf32, #tpu.memory_space<smem>>
    %17 = vector.broadcast %16 : f32 to vector<1x3x128xf32>
    %18 = arith.select %15, %17, %13 : vector<1x3x128xi1>, vector<1x3x128xf32>
    %c1_i32_5 = arith.constant 1 : i32
    %19 = vector.broadcast %c1_i32_5 : i32 to vector<1x3x128xi32>
    %20 = arith.cmpi eq, %4, %19 : vector<1x3x128xi32>
    %c3 = arith.constant 3 : index
    %21 = memref.load %arg3[%c3] : memref<5xf32, #tpu.memory_space<smem>>
    %22 = vector.broadcast %21 : f32 to vector<1x3x128xf32>
    %23 = arith.select %20, %22, %18 : vector<1x3x128xi1>, vector<1x3x128xf32>
    %c2_i32_6 = arith.constant 2 : i32
    %24 = vector.broadcast %c2_i32_6 : i32 to vector<1x3x128xi32>
    %25 = arith.cmpi eq, %4, %24 : vector<1x3x128xi32>
    %c4 = arith.constant 4 : index
    %26 = memref.load %arg3[%c4] : memref<5xf32, #tpu.memory_space<smem>>
    %27 = vector.broadcast %26 : f32 to vector<1x3x128xf32>
    %28 = arith.select %25, %27, %23 : vector<1x3x128xi1>, vector<1x3x128xf32>
    %cst_7 = arith.constant 0.000000e+00 : f32
    %29 = vector.broadcast %cst_7 : f32 to vector<1x3x128xf32>
    %30 = arith.select %12, %28, %29 : vector<1x3x128xi1>, vector<1x3x128xf32>
    %cst_8 = arith.constant 0.000000e+00 : f32
    %31 = vector.broadcast %cst_8 : f32 to vector<1x3x128xf32>
    %32 = arith.maximumf %0, %31 : vector<1x3x128xf32>
    %33 = arith.mulf %0, %1 : vector<1x3x128xf32>
    %34 = arith.subf %32, %33 : vector<1x3x128xf32>
    %35 = math.absf %0 : vector<1x3x128xf32>
    %cst_9 = arith.constant 0.000000e+00 : f32
    %36 = vector.broadcast %cst_9 : f32 to vector<1x3x128xf32>
    %37 = arith.subf %36, %35 : vector<1x3x128xf32>
    %38 = math.exp %37 : vector<1x3x128xf32>
    %39 = math.log1p %38 : vector<1x3x128xf32>
    %40 = arith.addf %34, %39 : vector<1x3x128xf32>
    %41 = arith.mulf %30, %40 : vector<1x3x128xf32>
    %42 = vector.shape_cast %41 : vector<1x3x128xf32> to vector<1x1x3x128xf32>
    %cst_10 = arith.constant dense<0.000000e+00> : vector<1xf32>
    %43 = vector.multi_reduction <add>, %42, %cst_10 [1, 2, 3] : vector<1x1x3x128xf32> to vector<1xf32>
    %44 = vector.shape_cast %43 : vector<1xf32> to vector<1x1x1x1xf32>
    %45 = vector.extract %44[0, 0, 0, 0] : f32 from vector<1x1x1x1xf32>
    %c0_11 = arith.constant 0 : index
    %c0_12 = arith.constant 0 : index
    %c0_13 = arith.constant 0 : index
    %46 = vector.load %arg1[%c0_11, %c0_12, %c0_13] : memref<1x3x128xf32, #tpu.memory_space<vmem>>, vector<1x3x128xf32>
    %47 = vector.shape_cast %46 : vector<1x3x128xf32> to vector<3x128xf32>
    %48 = vector.extract_strided_slice %47 {offsets = [1, 0], sizes = [1, 128], strides = [1, 1]} : vector<3x128xf32> to vector<1x128xf32>
    %49 = vector.extract_strided_slice %47 {offsets = [2, 0], sizes = [1, 128], strides = [1, 1]} : vector<3x128xf32> to vector<1x128xf32>
    %50 = vector.shape_cast %49 : vector<1x128xf32> to vector<1x128xf32>
    %51 = vector.broadcast %50 : vector<1x128xf32> to vector<128x128xf32>
    %c0_i32_14 = arith.constant 0 : i32
    %52 = tpu.dynamic_rotate %51 by %c0_i32_14 dim 1 {stride = 1 : si32, stride_dimension = 0 : si32} : vector<128x128xf32>, i32 -> vector<128x128xf32>
    %53 = arith.truncf %48 : vector<1x128xf32> to vector<1x128xbf16>
    %54 = arith.truncf %52 : vector<128x128xf32> to vector<128x128xbf16>
    %cst_15 = arith.constant dense<0.000000e+00> : vector<1x128xf32>
    %55 = tpu.matmul %53, %54, %cst_15 {dimension_numbers = #tpu.dot_dimension_numbers<[1], [0], [0], [1], [0, 0, 1, 1], [], []>} : vector<1x128xbf16>, vector<128x128xbf16>, vector<1x128xf32> -> vector<1x128xf32>
    %56 = arith.mulf %55, %55 : vector<1x128xf32>
    %57 = vector.shape_cast %56 : vector<1x128xf32> to vector<1x1x128xf32>
    %cst_16 = arith.constant dense<0.000000e+00> : vector<1xf32>
    %58 = vector.multi_reduction <add>, %57, %cst_16 [1, 2] : vector<1x1x128xf32> to vector<1xf32>
    %59 = vector.shape_cast %58 : vector<1xf32> to vector<1x1x1xf32>
    %60 = vector.extract %59[0, 0, 0] : f32 from vector<1x1x1xf32>
    %61 = arith.mulf %48, %48 : vector<1x128xf32>
    %62 = vector.shape_cast %61 : vector<1x128xf32> to vector<1x1x128xf32>
    %cst_17 = arith.constant dense<0.000000e+00> : vector<1xf32>
    %63 = vector.multi_reduction <add>, %62, %cst_17 [1, 2] : vector<1x1x128xf32> to vector<1xf32>
    %64 = vector.shape_cast %63 : vector<1xf32> to vector<1x1x1xf32>
    %65 = vector.extract %64[0, 0, 0] : f32 from vector<1x1x1xf32>
    %66 = arith.mulf %49, %49 : vector<1x128xf32>
    %67 = vector.shape_cast %66 : vector<1x128xf32> to vector<1x1x128xf32>
    %cst_18 = arith.constant dense<0.000000e+00> : vector<1xf32>
    %68 = vector.multi_reduction <add>, %67, %cst_18 [1, 2] : vector<1x1x128xf32> to vector<1xf32>
    %69 = vector.shape_cast %68 : vector<1xf32> to vector<1x1x1xf32>
    %70 = vector.extract %69[0, 0, 0] : f32 from vector<1x1x1xf32>
    %71 = arith.mulf %65, %70 : f32
    %cst_19 = arith.constant 9.99999996E-13 : f32
    %72 = arith.addf %71, %cst_19 : f32
    %73 = math.rsqrt %72 : f32
    %74 = arith.mulf %60, %73 : f32
    %cst_20 = arith.constant 0.000000e+00 : f32
    %75 = arith.addf %cst_20, %74 : f32
    %c0_21 = arith.constant 0 : index
    %76 = memref.load %arg3[%c0_21] : memref<5xf32, #tpu.memory_space<smem>>
    %77 = arith.mulf %76, %45 : f32
    %c1 = arith.constant 1 : index
    %78 = memref.load %arg3[%c1] : memref<5xf32, #tpu.memory_space<smem>>
    %79 = arith.mulf %78, %75 : f32
    %80 = arith.addf %77, %79 : f32
    %81 = tpu.iota {dimensions = array<i32: 2>} : vector<1x1x128xi32>
    %c0_i32_22 = arith.constant 0 : i32
    %82 = vector.broadcast %c0_i32_22 : i32 to vector<1x1x128xi32>
    %83 = arith.cmpi eq, %81, %82 : vector<1x1x128xi32>
    %cst_23 = arith.constant 0.000000e+00 : f32
    %84 = vector.broadcast %80 : f32 to vector<1x1x128xf32>
    %85 = vector.broadcast %cst_23 : f32 to vector<1x1x128xf32>
    %86 = arith.select %83, %84, %85 : vector<1x1x128xi1>, vector<1x1x128xf32>
    %c0_24 = arith.constant 0 : index
    %c0_25 = arith.constant 0 : index
    %c0_26 = arith.constant 0 : index
    %87 = vector.load %arg4[%c0_24, %c0_25, %c0_26] : memref<1x1x128xf32, #tpu.memory_space<vmem>>, vector<1x1x128xf32>
    tpu.vector_store %arg4[%c0_24, %c0_25, %c0_26], %86 {strides = array<i32>} : memref<1x1x128xf32, #tpu.memory_space<vmem>>, vector<1x1x128xf32>,
    return
  }
  func.func @transform_0(%arg0: i32) -> (i32, i32, i32) {
    %c0_i32 = arith.constant 0 : i32
    %c0_i32_0 = arith.constant 0 : i32
    %c0_i32_1 = arith.constant 0 : i32
    return %arg0, %c0_i32, %c0_i32_0 : i32, i32, i32
  }
  func.func @transform_1(%arg0: i32) -> (i32, i32, i32) {
    %c0_i32 = arith.constant 0 : i32
    %c0_i32_0 = arith.constant 0 : i32
    %c0_i32_1 = arith.constant 0 : i32
    return %arg0, %c0_i32, %c0_i32_0 : i32, i32, i32
  }
  func.func @transform_2(%arg0: i32) -> i32 {
    %c0_i32 = arith.constant 0 : i32
    %c0_i32_0 = arith.constant 0 : i32
    return %c0_i32 : i32
  }
  func.func @transform_3(%arg0: i32) -> (i32, i32, i32) {
    %c0_i32 = arith.constant 0 : i32
    %c0_i32_0 = arith.constant 0 : i32
    %c0_i32_1 = arith.constant 0 : i32
    return %arg0, %c0_i32, %c0_i32_0 : i32, i32, i32
  }
}

</mosaic_0001>

<bundles_post_ra>
// kernel: tpu_custom_call.1
= control target key start
LH: loop header
LB: loop body
LE: loop exit
PB: predicated region body
PF: predicated region fallthrough
CT: control target
= control target key end

     0   :  { %8 = vsyncpa [#allocation4], 0  ;;  %s927_s0 = inlined_call_operand.vmem [shape: f32[2,3,128], index: 0, kind: input, shape index: {}]   ;;  %s928_s1 = inlined_call_operand.vmem [shape: f32[2,3,128], index: 1, kind: input, shape index: {}]   ;;  %s929_s2 = inlined_call_operand.vmem [shape: f32[5], index: 2, kind: input, shape index: {}]   ;;  %s930_s3 = inlined_call_operand.hbm [shape: f32[2,1,128], index: 3, kind: output, shape index: {}]  }
   0x1   :  { %9 = vsyncpa [#allocation3], 0 }
   0x2   :  { %11 = vsyncpa [#allocation3 + $0x1], 0  ;;  %s766_s12 = smov 0   ;;  %s768_s13 = smov 0  }
   0x3   :  { %s770_s14 = smov 0   ;;  %s772_s15 = smov 0  }
   0x4 LB: > { %s787_s16 = sadd.s32 4294967295, %s724_s15   ;;  %s515_s17 = sadd.s32 4294967294, %s724_s15   ;;  %s724_s15 = sphi %s772_s15, %s937_s15   ;;  %s720_s14 = sphi %s770_s14, %s936_s14   ;;  %s716_s13 = sphi %s768_s13, %s935_s13   ;;  %s712_s12 = sphi %s766_s12, %s934_s12  }
   0x5   : > { %s791_s18 = sadd.s32 1, %s724_s15   ;;  %s97_s19 = sadd.s32 1, %s720_s14 }
   0x6   : > { %s94_s20 = ssub.s32 %s724_s15, %s791_s18  ;;  %p107_p0 = scmp.ne.s32.totalorder %s720_s14, %s716_s13 }
   0x7   : > { %p95_p1 = scmp.eq.s32.totalorder %s94_s20, 0  ;;  %p108_p2 = scmp.eq.s32.totalorder %s787_s16, 1 }
   0x8   : > { %p113_p3 = scmp.ne.s32.totalorder %s716_s13, %s712_s12  ;;  %p114_p4 = scmp.eq.s32.totalorder %s515_s17, 1 }
   0x9   : > { %s802_s21 = scalar_select %p95_p1, %s720_s14, %s97_s19  }
   0xa   : > { %p804_p5 = por %p108_p2, %p107_p0  ;;  %p808_p6 = por %p114_p4, %p113_p3 }
   0xb   : > { %p516_p7 = scmp.ge.s32.totalorder %s724_s15, 1  ;;  %p121_p8 = scmp.lt.s32.totalorder %s724_s15, 3 }
   0xc   : > { %p583_p9 = scmp.eq.s32.totalorder %s787_s16, 0  ;;  %s134_s27 = sshll.u32 %s929_s2, 4  ;;  %s135_s27 = int_to_ptr.vmem [resolvable:$true] %s134_s27 }
   0xd   : > { %p815_p10 = pnand %p516_p7, %p121_p8  ;;  %s643_s28 = scalar_lea.vmem %s135_s27, 16 }
   0xe   : > { %p644_p13 = scmp.ne.s32.totalorder %s135_s27, %s643_s28  ;;  %p651_p3 = scmp.lt.s32.totalorder %s135_s27, %s135_s27 }
   0xf   : > { %p575_p11 = pneg %p815_p10  ;;  %p652_p4 = scmp.lt.s32.totalorder %s643_s28, %s643_s28 }
  0x11   : > { %p576_p12 = pnand %p583_p9, %p575_p11  ;;  %p653_p7 = por %p652_p4, %p651_p3 }
  0x13   : > { %p645_p0 = pneg %p576_p12 }
  0x15   : > { %p646_p1 = pnand %p645_p0, %p644_p13 }
  0x17   : > { %p647_p2 = pneg %p646_p1 }
  0x19   : > { %p654_p8 = pnand %p653_p7, %p647_p2 }
  0x1b   : > { %657 = shalt.err (!%p654_p8)
}
  0x1c   : > { %s726_s29 = smov [#allocation2]   ;;  %161 = sbr.rel (%p815_p10) target bundleno = 708 (0x2c4), region = 32 }
  0x1d   : > { %578 = dma.vmem_to_smem (!%p576_p12), %s135_s27, 16, %s726_s29, [#allocation4]  }
  0x23   : > { %703 = dma.done.wait (%p583_p9), [#allocation4], 16  }
  0x24   : > { %705 = vsyncadd (%p583_p9), [#allocation4], 4294967280 }
  0x25   : > { %167 = sfence }
  0x26   : > { %p188_p11 = scmp.lt.s32.totalorder %s787_s16, 1  ;;  %v199_v0 = vlaneseq  ;;  %v727_v1 = vmov 0.0   ;;  %s728_s8 = smov 272   ;;  %vm740_vm0 = vmmov 0   ;;  %v204_v15 = vstv %s787_s16 }
  0x27   : > { %539 = vmatprep.subr.bf16.mxu0 %v727_v1  ;;  %s729_s9 = smov 256   ;;  %s730_s10 = smov 280   ;;  %555 = vmatprep.mubr.msk.bf16.mxu0 %vm740_vm0, %v727_v1  ;;  %vm205_vm3 = vcmp.lt.s32.totalorder %v204_v15, 2  ;;  %vm238_vm8 = vcmask 1042432   ;;  %vm370_vm9 = vcmask 1040384  }
  0x28   : > { %s835_s30 = scalar_select %p188_p11, %s787_s16, 1  ;;  %v837_v2 = vshrl.u32 %v199_v0, 7  ;;  %v857_v14 = vand.u32 127, %v199_v0 }
  0x29   : > { %s731_s11 = smov 264   ;;  %s732_s17 = smov 296  }
  0x2a   : > { %s521_s4 = sshll.u32 %s835_s30, 2  ;;  %v251_v3 = vsub.s32 2, %v837_v2  ;;  %s733_s19 = smov 288   ;;  %vm207_vm1 = vcmp.eq.s32.totalorder %v837_v2, 0  ;;  %vm211_vm2 = vcmp.eq.s32.totalorder %v837_v2, 1  ;;  %vm203_vm4 = vcmp.lt.s32.totalorder %v857_v14, 16 }
  0x2b   : > { %s191_s7 = scalar_lea.vmem %s927_s0, %s521_s4  ;;  %s734_s20 = smov 312   ;;  %vm215_vm5 = vcmp.eq.s32.totalorder %v837_v2, 2  ;;  %vm206_vm6 = vmand %vm203_vm4, %vm205_vm3  ;;  %vm419_vm10 = vcmp.eq.s32.totalorder %v857_v14, 0 }
  0x2c   : > { %v846_v4 = vld [vmem:[%s191_s7] sm:$0x7]  ;;  %s735_s24 = smov 304   ;;  %s736_s25 = smov 328  }
  0x2d   : > { %v252_v5 = vrot.slane %v846_v4, %v251_v3  ;;  %s737_s26 = smov 320   ;;  %s738_s27 = smov 344   ;;  %v223_v6 = vand.u32 2147483647, %v846_v4  ;;  %v220_v19 = vmax.f32 %v846_v4, 0.0  ;;  %v381_v29 = vmul.f32 %v846_v4, %v846_v4 }
  0x2e   : > { %s739_s28 = smov 336   ;;  %s741_s29 = smov 360   ;;  %v316_v62 = vpack.c.bf16 %v846_v4, %v846_v4 }
  0x2f   : > { %262 = vrot.lane.b32.xlu1 %v252_v5, %s728_s8  ;;  %254 = vrot.lane.b32.xlu0 %v252_v5, %s729_s9  ;;  %s742_s5 = smov 352   ;;  %s743_s6 = smov 376   ;;  %v224_v7 = vsub.f32 0.0, %v223_v6  ;;  %v383_v34 = vrot.slane %v381_v29, 1  ;;  %v395_v37 = vrot.slane %v381_v29, 2 }
  0x30   : > { %s744_s7 = smov 368   ;;  %s523_s8 = sld [smem:[#allocation2 + $0x2]]  ;;  %v326_v0 = vshrl.u32 %v316_v62, 16 }
  0x31   : > { %v225_v8 = vmul.f32 1.442695, %v224_v7  ;;  %s524_s9 = sld [smem:[#allocation2 + $0x3]]  ;;  %v385_v36 = vsel %vm370_vm9, %v383_v34, 0.0  ;;  %v397_v38 = vsel %vm370_vm9, %v395_v37, 0.0 }
  0x33   : > { %266 = vrot.lane.b32.xlu1 %v252_v5, %s730_s10  ;;  %258 = vrot.lane.b32.xlu0 %v252_v5, %s731_s11  ;;  %637 = vpow2.f32 %v225_v8  ;;  %s525_s10 = sld [smem:[#allocation2 + $0x4]] }
  0x36   : > { %v209_v11 = vstv %s523_s8 }
  0x37   : > { %274 = vrot.lane.b32.xlu1 %v252_v5, %s732_s17  ;;  %270 = vrot.lane.b32.xlu0 %v252_v5, %s733_s19  ;;  %s195_s19 = scalar_lea.vmem %s928_s1, %s521_s4  ;;  %v210_v16 = vsel %vm207_vm1, %v209_v11, 0.0  ;;  %v213_v17 = vstv %s524_s9  ;;  %s527_s9 = sshll.u32 %s787_s16, 4 }
  0x38   : > { %v198_v13 = vld [vmem:[%s195_s19] sm:$0x7]  ;;  %v214_v22 = vsel %vm211_vm2, %v213_v17, %v210_v16 }
  0x39   : > { %v221_v20 = vmul.f32 %v198_v13, %v846_v4  ;;  %v217_v23 = vstv %s525_s10 }
  0x3a   : > { %v218_v26 = vsel %vm215_vm5, %v217_v23, %v214_v22 }
  0x3b   : > { %282 = vrot.lane.b32.xlu1 %v252_v5, %s734_s20  ;;  %278 = vrot.lane.b32.xlu0 %v252_v5, %s735_s24  ;;  %v222_v27 = vsub.f32 %v220_v19, %v221_v20  ;;  %v219_v30 = vsel %vm206_vm6, %v218_v26, 0.0 }
  0x3d   : > { %v638_v9 = vpop.eup %637 }
  0x3e   : > { %v227_v10 = vadd.f32 1.0, %v638_v9  ;;  %v230_v12 = vmul.f32 -0.5, %v638_v9  ;;  %v233_v21 = vand.u32 2147483647, %v638_v9 }
  0x3f   : > { %290 = vrot.lane.b32.xlu1 %v252_v5, %s736_s25  ;;  %286 = vrot.lane.b32.xlu0 %v252_v5, %s737_s26 }
  0x40   : > { %639 = vlog2.f32 %v227_v10  ;;  %v231_v18 = vadd.f32 1.0, %v230_v12  ;;  %vm234_vm7 = vcmp.lt.f32.partialorder %v233_v21, 0.0004427343 }
  0x42   : > { %v232_v24 = vmul.f32 %v638_v9, %v231_v18 }
  0x43   : > { %298 = vrot.lane.b32.xlu1 %v252_v5, %s738_s27  ;;  %294 = vrot.lane.b32.xlu0 %v252_v5, %s739_s28  ;;  %s414_s27 = sld [smem:[#allocation2]]  ;;  %s526_s28 = sld [smem:[#allocation2 + $0x1]] }
  0x47   : > { %306 = vrot.lane.b32.xlu1 %v252_v5, %s741_s29  ;;  %302 = vrot.lane.b32.xlu0 %v252_v5, %s742_s5  ;;  %s186_s29 = sand.u32 1, %s716_s13  }
  0x48   : > { %s187_s10 = scalar_lea.vmem [#allocation5], %s186_s29 }
  0x49   : > { %s436_s11 = sshll.u32 %s187_s10, 4  ;;  %s887_s11 = int_to_ptr.vmem [resolvable:$true] %s436_s11 }
  0x4a   : > { %v640_v25 = vpop.eup %639  ;;  %s658_s16 = scalar_lea.vmem %s887_s11, 16 }
  0x4b   : > { %314 = vrot.lane.b32.xlu1 %v252_v5, %s743_s6  ;;  %310 = vrot.lane.b32.xlu0 %v252_v5, %s744_s7  ;;  %v229_v28 = vmul.f32 0.6931472, %v640_v25  ;;  %p659_p9 = scmp.ne.s32.totalorder %s887_s11, %s658_s16 }
  0x4d   : > { %v235_v31 = vsel %vm234_vm7, %v232_v24, %v229_v28  ;;  %p660_p10 = pnand %p659_p9, %p804_p5 }
  0x4e   : > { %v236_v32 = vadd.f32 %v235_v31, %v222_v27 }
  0x4f   : > { %p661_p12 = pneg %p660_p10 }
  0x50   : > { %v237_v33 = vmul.f32 %v236_v32, %v219_v30 }
  0x52   : > { %v239_v35 = vsel %vm238_vm8, %v237_v33, 0.0 }
  0x6a   : > { %240 = vadd.xlane.f32.xlu0 %v239_v35 }
  0x6e   : > { %386 = vadd.xlane.f32.xlu0 %v385_v36 }
  0x72   : > { %398 = vadd.xlane.f32.xlu0 %v397_v38 }
  0xa1   : > { %v263_v39 = vpop.permute.xlu1 %262  ;;  %v255_v40 = vpop.permute.xlu0 %254 }
  0xa5   : > { %v267_v41 = vpop.permute.xlu1 %266  ;;  %v259_v42 = vpop.permute.xlu0 %258 }
  0xa6   : > { %v317_v43 = vpack.c.bf16 %v259_v42, %v255_v40  ;;  %v318_v46 = vpack.c.bf16 %v267_v41, %v263_v39 }
  0xa8   : > { %540 = vmatpush3.bf16.msra.mxu0 %v317_v43 }
  0xa9   : > { %541 = vmatprep.subr.bf16.mxu0 %v727_v1  ;;  %v275_v44 = vpop.permute.xlu1 %274  ;;  %v271_v45 = vpop.permute.xlu0 %270 }
  0xaa   : > { %v319_v47 = vpack.c.bf16 %v275_v44, %v271_v45 }
  0xac   : > { %542 = vmatpush3.bf16.msra.mxu0 %v318_v46 }
  0xad   : > { %543 = vmatprep.subr.bf16.mxu0 %v727_v1  ;;  %v283_v48 = vpop.permute.xlu1 %282  ;;  %v279_v49 = vpop.permute.xlu0 %278 }
  0xae   : > { %v320_v50 = vpack.c.bf16 %v283_v48, %v279_v49 }
  0xb0   : > { %544 = vmatpush3.bf16.msra.mxu0 %v319_v47 }
  0xb1   : > { %545 = vmatprep.subr.bf16.mxu0 %v727_v1  ;;  %v291_v51 = vpop.permute.xlu1 %290  ;;  %v287_v52 = vpop.permute.xlu0 %286 }
  0xb2   : > { %v321_v53 = vpack.c.bf16 %v291_v51, %v287_v52 }
  0xb4   : > { %546 = vmatpush3.bf16.msra.mxu0 %v320_v50 }
  0xb5   : > { %547 = vmatprep.subr.bf16.mxu0 %v727_v1  ;;  %v299_v54 = vpop.permute.xlu1 %298  ;;  %v295_v55 = vpop.permute.xlu0 %294 }
  0xb6   : > { %v322_v56 = vpack.c.bf16 %v299_v54, %v295_v55 }
  0xb8   : > { %548 = vmatpush3.bf16.msra.mxu0 %v321_v53 }
  0xb9   : > { %549 = vmatprep.subr.bf16.mxu0 %v727_v1  ;;  %v307_v57 = vpop.permute.xlu1 %306  ;;  %v303_v58 = vpop.permute.xlu0 %302 }
  0xba   : > { %v323_v59 = vpack.c.bf16 %v307_v57, %v303_v58 }
  0xbc   : > { %550 = vmatpush3.bf16.msra.mxu0 %v322_v56 }
  0xbd   : > { %551 = vmatprep.subr.bf16.mxu0 %v727_v1  ;;  %v315_v60 = vpop.permute.xlu1 %314  ;;  %v311_v61 = vpop.permute.xlu0 %310 }
  0xbe   : > { %v324_v63 = vpack.c.bf16 %v315_v60, %v311_v61 }
  0xc0   : > { %552 = vmatpush3.bf16.msra.mxu0 %v323_v59 }
  0xc1   : > { %553 = vmatprep.subr.bf16.mxu0 %v727_v1 }
  0xc4   : > { %554 = vmatpush3.bf16.msra.mxu0 %v324_v63 }
  0xc7   : > { %556 = vmatmul.mubr.bf16.vlgmr.msra.gmra.mrb[0].mxu0 %v326_v0 }
  0xf7   : > { %v241_v2 = vpop.xlane.xlu0 %240 }
  0xf8   : > { %v242_v3 = vrot.slane %v241_v2, 4 }
  0xfa   : > { %v243_v5 = vadd.f32 %v242_v3, %v241_v2 }
  0xfb   : > { %v387_v1 = vpop.xlane.xlu0 %386 }
  0xfc   : > { %v244_v6 = vrot.slane %v243_v5, 2  ;;  %v388_v17 = vrot.slane %v387_v1, 4 }
  0xfe   : > { %v245_v7 = vadd.f32 %v244_v6, %v243_v5  ;;  %v389_v19 = vadd.f32 %v388_v17, %v387_v1 }
  0xff   : > { %v399_v16 = vpop.xlane.xlu0 %398 }
 0x100   : > { %v246_v8 = vrot.slane %v245_v7, 1  ;;  %v400_v18 = vrot.slane %v399_v16, 4  ;;  %v390_v21 = vrot.slane %v389_v19, 2 }
 0x102   : > { %v247_v9 = vadd.f32 %v246_v8, %v245_v7  ;;  %v401_v20 = vadd.f32 %v400_v18, %v399_v16  ;;  %v391_v26 = vadd.f32 %v390_v21, %v389_v19 }
 0x104   : > { %559 = vpush %v247_v9  ;;  %v402_v23 = vrot.slane %v401_v20, 2  ;;  %v392_v30 = vrot.slane %v391_v26, 1 }
 0x106   : > { %v403_v27 = vadd.f32 %v402_v23, %v401_v20  ;;  %v393_v34 = vadd.f32 %v392_v30, %v391_v26 }
 0x108   : > { %v404_v32 = vrot.slane %v403_v27, 1 }
 0x10a   : > { %v405_v35 = vadd.f32 %v404_v32, %v403_v27 }
 0x135   : > { %s560_s30 = spop %559 }
 0x136   : > { %s415_s7 = smul.f32 %s560_s30, %s414_s27  ;;  %s424_s30 = scalar_lea.sflag [#allocation3], %s186_s29 }
 0x19a   : > { %v363_v10 = vpop.f32.mrb[0].mxu0 }
 0x19b   : > { %v369_v11 = vmul.f32 %v363_v10, %v363_v10  ;;  %v557_v12 = vpop.f32.mrb[1].mxu0 }
 0x19c   : > { %v366_v13 = vpop.f32.mrb[2].mxu0 }
 0x19d   : > { %v558_v4 = vpop.f32.mrb[3].mxu0  ;;  %v371_v15 = vsel %vm370_vm9, %v369_v11, 0.0 }
 0x19e   : > { %372 = vadd.xlane.f32.xlu1 %v371_v15 }
 0x22b   : > { %v373_v22 = vpop.xlane.xlu1 %372 }
 0x22c   : > { %v374_v24 = vrot.slane %v373_v22, 4 }
 0x22e   : > { %v375_v25 = vadd.f32 %v374_v24, %v373_v22 }
 0x230   : > { %v376_v28 = vrot.slane %v375_v25, 2 }
 0x232   : > { %v377_v29 = vadd.f32 %v376_v28, %v375_v25 }
 0x234   : > { %v378_v31 = vrot.slane %v377_v29, 1 }
 0x236   : > { %v379_v33 = vadd.f32 %v378_v31, %v377_v29 }
 0x238   : > { %561 = vpush %v379_v33 }
 0x239   : > { %563 = vpush %v393_v34 }
 0x23a   : > { %565 = vpush %v405_v35 }
 0x269   : > { %s562_s4 = spop %561 }
 0x26a   : > { %s564_s20 = spop %563 }
 0x26b   : > { %s566_s24 = spop %565 }
 0x26c   : > { %s407_s25 = smul.f32 %s566_s24, %s564_s20  ;;  %s885_s24 = scalar_lea.hbm %s930_s3, %s527_s9 }
 0x26e   : > { %s408_s26 = sadd.f32 1e-12, %s407_s25 }
 0x270   : > { %v409_v36 = vstv %s408_s26 }
 0x271   : > { %641 = vrsqrt.f32 %v409_v36 }
 0x27b   : > { %v642_v37 = vpop.eup %641 }
 0x27c   : > { %567 = vpush %v642_v37 }
 0x2ad   : > { %s568_s5 = spop %567 }
 0x2ae   : > { %s412_s6 = smul.f32 %s568_s5, %s562_s4  ;;  %s745_s4 = smov [#allocation5]  }
 0x2af   : > { %s662_s25 = sshll.u32 %s745_s4, 4  ;;  %s663_s25 = int_to_ptr.vmem [resolvable:$false] %s662_s25 }
 0x2b0   : > { %s417_s8 = smul.f32 %s526_s28, %s412_s6  ;;  %s664_s26 = scalar_lea.vmem %s663_s25, 32 }
 0x2b1   : > { %p665_p13 = scmp.lt.s32.totalorder %s887_s11, %s663_s25  ;;  %p666_p0 = scmp.lt.s32.totalorder %s664_s26, %s658_s16 }
 0x2b2   : > { %s418_s17 = sadd.f32 %s417_s8, %s415_s7 }
 0x2b3   : > { %p667_p1 = por %p666_p0, %p665_p13 }
 0x2b4   : > { %v420_v38 = vstv %s418_s17 }
 0x2b5   : > { %v421_v39 = vsel %vm419_vm10, %v420_v38, 0.0  ;;  %p668_p2 = pnand %p667_p1, %p661_p12 }
 0x2b6   : > { %422 = vst [vmem:[%s187_s10] sm:$0x1] %v421_v39 }
 0x2b7   : > { %671 = shalt.err (!%p668_p2)
}
 0x2b8   : > { %s672_s27 = scalar_lea.hbm %s885_s24, 16  ;;  %s676_s5 = scalar_lea.hbm %s930_s3, 32 }
 0x2b9   : > { %p673_p3 = scmp.ne.s32.totalorder %s885_s24, %s672_s27  ;;  %p677_p8 = scmp.lt.u32.totalorder %s885_s24, %s930_s3 }
 0x2ba   : > { %p678_p11 = scmp.lt.u32.totalorder %s676_s5, %s672_s27  ;;  %p680_p10 = scmp.lt.u32.totalorder %s672_s27, %s885_s24 }
 0x2bb   : > { %p674_p4 = pnand %p673_p3, %p804_p5 }
 0x2bc   : > { %p679_p9 = por %p678_p11, %p677_p8 }
 0x2bd   : > { %p675_p7 = pneg %p674_p4 }
 0x2be   : > { %p681_p12 = por %p680_p10, %p679_p9 }
 0x2c0   : > { %p682_p13 = pnand %p681_p12, %p675_p7 }
 0x2c2   : > { %685 = shalt.err (!%p682_p13)
}
 0x2c3   : > { %573 = dma.vmem_to_hbm [thread:$0]  (%p804_p5), %s887_s11, 16, %s885_s24, %s424_s30  }
 0x2c4 PF: > { %p585_p0 = scmp.ge.s32.totalorder %s724_s15, 2  ;;  %s448_s8 = sand.u32 1, %s712_s12  }
 0x2c5   : > { %s449_s9 = scalar_lea.sflag [#allocation3], %s448_s8 }
 0x2c6   : > { %p580_p1 = pnand %p585_p0, %p808_p6 }
 0x2c8   : > { %707 = dma.done.wait (!%p580_p1), %s449_s9, 16  }
 0x2c9   : > { %709 = vsyncadd (!%p580_p1), %s449_s9, 4294967280  ;;  %p14_p2 = scmp.ge.s32.totalorder %s791_s18, 4   ;;  %s934_s12 = smov %s716_s13 }
 0x2ca   : > { %s935_s13 = smov %s720_s14  ;;  %s936_s14 = smov %s802_s21 }
 0x2cb   : > { %s937_s15 = smov %s791_s18  ;;  %16 = sbr.rel (!%p14_p2) target bundleno = 4 (0x4), region = 75 }
 0x2d2   :  { %453 = vsyncpa [#allocation3], 1 }
 0x2d3   :  { %455 = vsyncpa [#allocation3 + $0x1], 1 }
 0x2d4   :  { %456 = vsyncpa [#allocation4], 1 }
 0x2d5   :  { %458 = vsyncpa [#allocation4 + $0x1], 1 }

</bundles_post_ra>
